<compile_context>
chip_gen: v7x
topology: tpu7x:2x2x1
jax: 0.10.0
libtpu: 0.0.40
codegen_flags: <defaults>
</compile_context>

<pallas_src>
import functools

import jax
import jax.numpy as jnp
import numpy as np
from jax.experimental import pallas as pl
from jax.experimental.pallas import tpu as pltpu


def _round_up(a, b):
    return pl.cdiv(a, b) * b


# ---------------------------------------------------------------------------
# Pallas kernel: folded rule firing -> (deferred) L1 normalise -> TS consequent
# ---------------------------------------------------------------------------
def _anfis_kernel(xT_ref, rmat_ref, thetaT_ref, out_ref, *, tn, n_in, n_out):
    n_in_p1 = n_in + 1
    x = xT_ref[...]                                   # (n_in, tn) rows-on-lanes
    ones = jnp.ones((1, tn), jnp.float32)

    # ---- Layers 1+2 fused: rule firing strengths via one MXU dot + one exp.
    # Rmat = [RA | RB | rc] folds Gaussian log-memberships and the binary rule
    # selection;  xaug = [x^2 ; x ; 1].
    xaug = jnp.concatenate([x * x, x, ones], axis=0)  # (2*NI+1, tn)
    w = jnp.exp(jnp.dot(rmat_ref[...], xaug,
                        preferred_element_type=jnp.float32))      # (R, tn)

    # ---- Layer 3: L1 normalisation (torch F.normalize p=1, eps=1e-12).
    # w = exp(.) > 0 so |w| == w.  The per-row scale is applied at the end on
    # the (n_out, tn) result instead of the (R, tn) tensor (fewer VPU ops).
    inv = 1.0 / jnp.maximum(jnp.sum(w, axis=0, keepdims=True), 1e-12)  # (1, tn)

    # ---- Layers 4/5: Takagi-Sugeno consequent, one fused MXU dot ----
    # thetaT[o*(NI+1)+k, r] = theta[r*(NI+1)+k, o]
    # w2[o*(NI+1)+k, n]     = sum_r theta[r*(NI+1)+k, o] * w[r, n]
    w2 = jnp.dot(thetaT_ref[...], w,
                 preferred_element_type=jnp.float32)  # (n_out*(NI+1), tn)
    xext = jnp.concatenate([x, ones], axis=0)         # (NI+1, tn) = [x; 1]
    rows = []
    for o in range(n_out):                            # static, tiny unroll
        blk = w2[o * n_in_p1:(o + 1) * n_in_p1, :]    # (NI+1, tn)
        rows.append(jnp.sum(blk * xext, axis=0, keepdims=True))   # (1, tn)
    out_ref[...] = jnp.concatenate(rows, axis=0) * inv            # (n_out, tn)


# ---------------------------------------------------------------------------
# Wrapper (plain-JAX glue: parameter folding, flatten/transpose, padding)
# ---------------------------------------------------------------------------
def anfis_forward(x, mf_mean, mf_std, rules, theta, *, tile_cols=1024):
    """ANFIS Takagi-Sugeno forward.

    x:       (B, T, NI)            input
    mf_mean: (NI, n_mf)            Gaussian MF centers
    mf_std:  (NI, n_mf)            Gaussian MF widths
    rules:   (R, NI*n_mf)          binary antecedent rule matrix
    theta:   (R*(NI+1), NO)        Takagi-Sugeno consequent parameters
    returns: (B, T, NO)
    """
    b, t, n_in = x.shape
    n_mf = mf_mean.shape[1]
    n_rules = rules.shape[0]
    n_in_p1 = n_in + 1
    n_out = theta.shape[1]
    n_rows = b * t

    # Lane tile: large (amortize per-grid-step overhead), multiple of 128.
    tn = min(tile_cols, _round_up(n_rows, 128))
    n_pad = _round_up(n_rows, tn)
    # Keep >=2 grid steps when rows allow, so dual-TC chips (v7x) can shard
    # the "parallel" axis instead of idling one core.
    if n_rows >= 256 and n_pad // tn < 2:
        tn = _round_up(pl.cdiv(n_rows, 2), 128)
        n_pad = _round_up(n_rows, tn)
    grid = (n_pad // tn,)

    # Rows-on-lanes layout; zero-pad the row remainder (sliced off afterwards).
    xf = x.reshape(n_rows, n_in).astype(jnp.float32)
    xT = jnp.pad(xf.T, ((0, 0), (0, n_pad - n_rows)))            # (NI, n_pad)

    # -------- Parameter-only preprocessing (independent of x) --------
    # Gaussian log-membership as quadratic:  c2*x^2 + bq*x + cq
    c2 = -1.0 / (2.0 * jnp.square(mf_std.astype(jnp.float32)))   # (NI, n_mf)
    mean_f = mf_mean.astype(jnp.float32)
    bq = -2.0 * c2 * mean_f
    cq = c2 * mean_f * mean_f
    # Fold the binary rule selection:  log w[r] = RA@x^2 + RB@x + rc
    rules_r = rules.astype(jnp.float32).reshape(n_rules, n_in, n_mf)
    RA = jnp.einsum('rim,im->ri', rules_r, c2)                   # (R, NI)
    RB = jnp.einsum('rim,im->ri', rules_r, bq)                   # (R, NI)
    rc = jnp.einsum('rim,im->r', rules_r, cq)                    # (R,)
    rmat = jnp.concatenate([RA, RB, rc[:, None]], axis=1)        # (R, 2*NI+1)

    thetaT = jnp.transpose(
        theta.reshape(n_rules, n_in_p1, n_out).astype(jnp.float32),
        (2, 1, 0)).reshape(n_out * n_in_p1, n_rules)             # (NO*(NI+1), R)

    kernel = functools.partial(_anfis_kernel, tn=tn, n_in=n_in, n_out=n_out)

    out = pl.pallas_call(
        kernel,
        out_shape=jax.ShapeDtypeStruct((n_out, n_pad), jnp.float32),
        grid_spec=pltpu.PrefetchScalarGridSpec(
            num_scalar_prefetch=0,
            grid=grid,
            in_specs=[
                pl.BlockSpec((n_in, tn), lambda i: (0, i)),              # x^T
                pl.BlockSpec((n_rules, 2 * n_in + 1), lambda i: (0, 0)),  # folded rules
                pl.BlockSpec((n_out * n_in_p1, n_rules), lambda i: (0, 0)),  # theta^T
            ],
            out_specs=pl.BlockSpec((n_out, tn), lambda i: (0, i)),
        ),
        compiler_params=pltpu.CompilerParams(
            dimension_semantics=("parallel",)),
    )(xT, rmat, thetaT)

    return out[:, :n_rows].T.reshape(b, t, n_out)


# ---------------------------------------------------------------------------
# Pure-JAX reference (for correctness check)
# ---------------------------------------------------------------------------
def anfis_reference(x, mf_mean, mf_std, rules, theta):
    b, t, n_in = x.shape
    n_mf = mf_mean.shape[1]
    n_out = theta.shape[1]
    xf = x.reshape(b * t, n_in)
    # memberships
    mu = jnp.exp(-(xf[:, :, None] - mf_mean[None]) ** 2 /
                 (2.0 * mf_std[None] ** 2)).reshape(b * t, n_in * n_mf)
    # rule firing (product of selected memberships)
    sel = rules[None, :, :]                                    # (1, R, F)
    w = jnp.prod(sel * mu[:, None, :] + (1.0 - sel), axis=-1)  # (N, R)
    # L1 normalise
    w = w / jnp.maximum(jnp.sum(jnp.abs(w), axis=-1, keepdims=True), 1e-12)
    # Takagi-Sugeno consequent
    x_ext = jnp.concatenate([xf, jnp.ones((b * t, 1), jnp.float32)], axis=1)
    z = (w[:, :, None] * x_ext[:, None, :]).reshape(b * t, -1)
    out = z @ theta
    return out.reshape(b, t, n_out)


if __name__ == "__main__":
    # Small deterministic configuration consistent with ANFIS.__init__
    NUM_INPUTS = 4
    NUM_OUTPUTS = 2
    N_MF = 2                                  # Gaussian MFs per input universe
    B, T = 2, 200                             # batch, sequence rows (exercises
                                              # padding + multi-tile grid)

    key = jax.random.PRNGKey(0)
    kx, kt = jax.random.split(key)
    x = jax.random.normal(kx, (B, T, NUM_INPUTS), dtype=jnp.float32)

    # Deterministic antecedent parameters (Gaussian MFs per input universe)
    mf_mean = jnp.stack(
        [jnp.linspace(-1.0, 1.0, N_MF) + 0.05 * i for i in range(NUM_INPUTS)], axis=0
    ).astype(jnp.float32)                                        # (NI, n_mf)
    mf_std = jnp.full((NUM_INPUTS, N_MF), 1.0, jnp.float32) + \
        0.1 * jnp.arange(NUM_INPUTS, dtype=jnp.float32)[:, None]

    # Rule base: full Cartesian product of one MF per input (standard ANFIS grid)
    n_rules = N_MF ** NUM_INPUTS
    n_func = NUM_INPUTS * N_MF
    rules_np = np.zeros((n_rules, n_func), dtype=np.float32)
    for r in range(n_rules):
        rr = r
        for i in range(NUM_INPUTS):
            m = rr % N_MF
            rr //= N_MF
            rules_np[r, i * N_MF + m] = 1.0
    rules = jnp.asarray(rules_np)

    # Takagi-Sugeno theta: generate_theta(R * (num_inputs + 1)) -> (R*(NI+1), NO)
    theta = (0.01 * jax.random.normal(
        kt, (n_rules * (NUM_INPUTS + 1), NUM_OUTPUTS), dtype=jnp.float32))

    out = anfis_forward(x, mf_mean, mf_std, rules, theta)
    out = jax.block_until_ready(out)

    ref = anfis_reference(x, mf_mean, mf_std, rules, theta)
    # Log-space rule product (exp of a folded quadratic sum) vs product of exps
    # is mathematically identical but bit-inexact; tolerance covers the
    # reordering.
    np.testing.assert_allclose(np.asarray(out), np.asarray(ref),
                               rtol=2e-4, atol=1e-6)

    # TODO(synk): Tsukamoto / Lee system types and non-backward parameter
    # updates (recursive LSE), plus rule-string parsing / state_dict handling,
    # are host-side Python with no clean single-kernel equivalent; only the
    # default Takagi-Sugeno 'backward' forward path is implemented here.
    print("KERNEL_OK")
</pallas_src>

<mosaic_0001>
module attributes {stable_mosaic.version = 11 : i64} {
  func.func @_anfis_kernel(%arg0: i32, %arg1: memref<4x256xf32, #tpu.memory_space<vmem>>, %arg2: memref<16x9xf32, #tpu.memory_space<vmem>>, %arg3: memref<10x16xf32, #tpu.memory_space<vmem>>, %arg4: memref<2x256xf32, #tpu.memory_space<vmem>>) attributes {dimension_semantics = [#tpu.dimension_semantics<parallel>], iteration_bounds = array<i64: 2>, scalar_prefetch = 0 : i64, scratch_operands = 0 : i64, tpu.core_type = #tpu.core_type<tc>, window_params = [{transform_indices = @transform_0, window_bounds = array<i64: 4, 256>}, {pipeline_mode = #tpu.pipeline_mode<synchronous>, transform_indices = @transform_1, window_bounds = array<i64: 16, 9>}, {pipeline_mode = #tpu.pipeline_mode<synchronous>, transform_indices = @transform_2, window_bounds = array<i64: 10, 16>}, {transform_indices = @transform_3, window_bounds = array<i64: 2, 256>}]} {
    %c0 = arith.constant 0 : index
    %c0_0 = arith.constant 0 : index
    %0 = vector.load %arg1[%c0, %c0_0] : memref<4x256xf32, #tpu.memory_space<vmem>>, vector<4x256xf32>
    %cst = arith.constant 1.000000e+00 : f32
    %1 = vector.broadcast %cst : f32 to vector<1x256xf32>
    %2 = arith.mulf %0, %0 : vector<4x256xf32>
    %3 = tpu.concatenate %2, %0, %1 in 0 : vector<4x256xf32>, vector<4x256xf32>, vector<1x256xf32> -> vector<9x256xf32>
    %c0_1 = arith.constant 0 : index
    %c0_2 = arith.constant 0 : index
    %4 = vector.load %arg2[%c0_1, %c0_2] : memref<16x9xf32, #tpu.memory_space<vmem>>, vector<16x9xf32>
    %cst_3 = arith.constant dense<0.000000e+00> : vector<16x256xf32>
    %5 = tpu.matmul %4, %3, %cst_3 {dimension_numbers = #tpu.dot_dimension_numbers<[1], [0], [0], [1], [0, 0, 1, 1], [], []>} : vector<16x9xf32>, vector<9x256xf32>, vector<16x256xf32> -> vector<16x256xf32>
    %6 = math.exp %5 : vector<16x256xf32>
    %cst_4 = arith.constant dense<0.000000e+00> : vector<256xf32>
    %7 = vector.multi_reduction <add>, %6, %cst_4 [0] : vector<16x256xf32> to vector<256xf32>
    %8 = vector.shape_cast %7 : vector<256xf32> to vector<1x256xf32>
    %cst_5 = arith.constant 9.99999996E-13 : f32
    %9 = vector.broadcast %cst_5 : f32 to vector<1x256xf32>
    %10 = arith.maximumf %8, %9 : vector<1x256xf32>
    %cst_6 = arith.constant 1.000000e+00 : f32
    %11 = vector.broadcast %cst_6 : f32 to vector<1x256xf32>
    %12 = arith.divf %11, %10 : vector<1x256xf32>
    %c0_7 = arith.constant 0 : index
    %c0_8 = arith.constant 0 : index
    %13 = vector.load %arg3[%c0_7, %c0_8] : memref<10x16xf32, #tpu.memory_space<vmem>>, vector<10x16xf32>
    %cst_9 = arith.constant dense<0.000000e+00> : vector<10x256xf32>
    %14 = tpu.matmul %13, %6, %cst_9 {dimension_numbers = #tpu.dot_dimension_numbers<[1], [0], [0], [1], [0, 0, 1, 1], [], []>} : vector<10x16xf32>, vector<16x256xf32>, vector<10x256xf32> -> vector<10x256xf32>
    %15 = tpu.concatenate %0, %1 in 0 : vector<4x256xf32>, vector<1x256xf32> -> vector<5x256xf32>
    %16 = vector.extract_strided_slice %14 {offsets = [0, 0], sizes = [5, 256], strides = [1, 1]} : vector<10x256xf32> to vector<5x256xf32>
    %17 = arith.mulf %16, %15 : vector<5x256xf32>
    %cst_10 = arith.constant dense<0.000000e+00> : vector<256xf32>
    %18 = vector.multi_reduction <add>, %17, %cst_10 [0] : vector<5x256xf32> to vector<256xf32>
    %19 = vector.shape_cast %18 : vector<256xf32> to vector<1x256xf32>
    %20 = vector.extract_strided_slice %14 {offsets = [5, 0], sizes = [5, 256], strides = [1, 1]} : vector<10x256xf32> to vector<5x256xf32>
    %21 = arith.mulf %20, %15 : vector<5x256xf32>
    %cst_11 = arith.constant dense<0.000000e+00> : vector<256xf32>
    %22 = vector.multi_reduction <add>, %21, %cst_11 [0] : vector<5x256xf32> to vector<256xf32>
    %23 = vector.shape_cast %22 : vector<256xf32> to vector<1x256xf32>
    %24 = tpu.concatenate %19, %23 in 0 : vector<1x256xf32>, vector<1x256xf32> -> vector<2x256xf32>
    %25 = vector.broadcast %12 : vector<1x256xf32> to vector<2x256xf32>
    %26 = arith.mulf %24, %25 : vector<2x256xf32>
    %c0_12 = arith.constant 0 : index
    %c0_13 = arith.constant 0 : index
    %27 = vector.load %arg4[%c0_12, %c0_13] : memref<2x256xf32, #tpu.memory_space<vmem>>, vector<2x256xf32>
    tpu.vector_store %arg4[%c0_12, %c0_13], %26 {strides = array<i32>} : memref<2x256xf32, #tpu.memory_space<vmem>>, vector<2x256xf32>,
    return
  }
  func.func @transform_0(%arg0: i32) -> (i32, i32) {
    %c0_i32 = arith.constant 0 : i32
    %c0_i32_0 = arith.constant 0 : i32
    return %c0_i32, %arg0 : i32, i32
  }
  func.func @transform_1(%arg0: i32) -> (i32, i32) {
    %c0_i32 = arith.constant 0 : i32
    %c0_i32_0 = arith.constant 0 : i32
    %c0_i32_1 = arith.constant 0 : i32
    return %c0_i32, %c0_i32_0 : i32, i32
  }
  func.func @transform_2(%arg0: i32) -> (i32, i32) {
    %c0_i32 = arith.constant 0 : i32
    %c0_i32_0 = arith.constant 0 : i32
    %c0_i32_1 = arith.constant 0 : i32
    return %c0_i32, %c0_i32_0 : i32, i32
  }
  func.func @transform_3(%arg0: i32) -> (i32, i32) {
    %c0_i32 = arith.constant 0 : i32
    %c0_i32_0 = arith.constant 0 : i32
    return %c0_i32, %arg0 : i32, i32
  }
}

</mosaic_0001>

<bundles_post_ra>
// kernel: tpu_custom_call.1
= control target key start
LH: loop header
LB: loop body
LE: loop exit
PB: predicated region body
PF: predicated region fallthrough
CT: control target
= control target key end

     0   :  { %8 = vsyncpa [#allocation3], 0  ;;  %s1162_s0 = inlined_call_operand.hbm [shape: f32[4,512], index: 0, kind: input, shape index: {}]   ;;  %s1163_s1 = inlined_call_operand.hbm [shape: f32[16,9], index: 1, kind: input, shape index: {}]   ;;  %s1164_s2 = inlined_call_operand.hbm [shape: f32[10,16], index: 2, kind: input, shape index: {}]   ;;  %s1165_s3 = inlined_call_operand.hbm [shape: f32[2,512], index: 3, kind: output, shape index: {}]  }
   0x1   :  { %10 = vsyncpa [#allocation3 + $0x1], 0 }
   0x2   :  { %11 = vsyncpa [#allocation6], 0 }
   0x3   :  { %12 = vsyncpa [#allocation4], 0 }
   0x4   :  { %14 = vsyncpa [#allocation4 + $0x1], 0  ;;  %s921_s12 = smov 0   ;;  %s923_s13 = smov 0  }
   0x5   :  { %s925_s14 = smov 0   ;;  %s927_s15 = smov 0  }
   0x6 LB: > { %s942_s16 = sadd.s32 4294967295, %s890_s15   ;;  %s611_s17 = sadd.s32 4294967294, %s890_s15   ;;  %s890_s15 = sphi %s927_s15, %s1185_s15   ;;  %s886_s14 = sphi %s925_s14, %s1184_s14   ;;  %s882_s13 = sphi %s923_s13, %s1183_s13   ;;  %s878_s12 = sphi %s921_s12, %s1182_s12  }
   0x7   : > { %p40_p0 = scmp.ne.s32.totalorder %s882_s13, %s878_s12  ;;  %p1166_p1 = scmp.eq.s32.totalorder %s942_s16, 0 }
   0x8   : > { %p112_p3 = scmp.eq.s32.totalorder %s611_s17, 1  ;;  %p612_p5 = scmp.ge.s32.totalorder %s890_s15, 1 }
   0x9   : > { %p951_p4 = por %p1166_p1, %p40_p0  ;;  %p119_p7 = scmp.lt.s32.totalorder %s890_s15, 3 }
   0xa   : > { %p956_p6 = por %p112_p3, %p40_p0  ;;  %s892_s21 = smov [#allocation5]  }
   0xb   : > { %s1169_s18 = scalar_select %p951_p4, 1, 0 }
   0xc   : > { %s1170_s19 = scalar_select %p956_p6, 1, 0 }
   0xd   : > { %p961_p8 = pnand %p612_p5, %p119_p7  ;;  %s131_s22 = sshll.u32 %s892_s21, 4  ;;  %s965_s22 = int_to_ptr.vmem [resolvable:$true] %s131_s22 }
   0xe   : > { %s893_s24 = smov [#allocation7]   ;;  %s734_s28 = scalar_lea.hbm %s1163_s1, 256 }
   0xf   : > { %p660_p9 = pneg %p961_p8  ;;  %s144_s25 = sshll.u32 %s893_s24, 4  ;;  %s976_s25 = int_to_ptr.vmem [resolvable:$true] %s144_s25 }
  0x10   : > { %p735_p12 = scmp.ne.s32.totalorder %s1163_s1, %s734_s28  ;;  %p741_p5 = scmp.lt.u32.totalorder %s734_s28, %s1163_s1 }
  0x11   : > { %p972_p11 = pnand %p660_p9, %p1166_p1 }
  0x13   : > { %p736_p13 = pneg %p972_p11 }
  0x15   : > { %p737_p0 = pnand %p736_p13, %p735_p12 }
  0x17   : > { %p738_p3 = pneg %p737_p0 }
  0x19   : > { %p743_p7 = pnand %p741_p5, %p738_p3 }
  0x1b   : > { %746 = shalt.err (!%p743_p7)
}
  0x1c   : > { %s747_s6 = scalar_lea.vmem %s965_s22, 256  ;;  %p755_p2 = scmp.lt.s32.totalorder %s965_s22, %s965_s22 }
  0x1d   : > { %p748_p9 = scmp.ne.s32.totalorder %s965_s22, %s747_s6  ;;  %p756_p12 = scmp.lt.s32.totalorder %s747_s6, %s747_s6 }
  0x1f   : > { %p750_p10 = pnand %p748_p9, %p736_p13  ;;  %p757_p0 = por %p756_p12, %p755_p2 }
  0x21   : > { %p751_p1 = pneg %p750_p10 }
  0x23   : > { %p758_p6 = pnand %p757_p0, %p751_p1 }
  0x25   : > { %761 = shalt.err (!%p758_p6)
}
  0x26   : > { %s894_s7 = smov 128   ;;  %s895_s8 = smov 8  }
  0x27   : > { %663 = dma.hbm_to_vmem [thread:$0]  (!%p972_p11), %s1163_s1, 256, %s965_s22, [#allocation6], %s894_s7, %s894_s7, %s895_s8  }
  0x28   : > { %s762_s21 = scalar_lea.hbm %s1164_s2, 256 }
  0x29   : > { %p763_p2 = scmp.ne.s32.totalorder %s1164_s2, %s762_s21  ;;  %p769_p10 = scmp.lt.u32.totalorder %s762_s21, %s1164_s2 }
  0x2b   : > { %p765_p1 = pnand %p763_p2, %p736_p13 }
  0x2d   : > { %p766_p6 = pneg %p765_p1 }
  0x2f   : > { %p771_p3 = pnand %p769_p10, %p766_p6 }
  0x31   : > { %774 = shalt.err (!%p771_p3)
}
  0x32   : > { %s775_s22 = scalar_lea.vmem %s976_s25, 256  ;;  %p783_p12 = scmp.lt.s32.totalorder %s976_s25, %s976_s25 }
  0x33   : > { %p776_p5 = scmp.ne.s32.totalorder %s976_s25, %s775_s22  ;;  %p784_p0 = scmp.lt.s32.totalorder %s775_s22, %s775_s22 }
  0x35   : > { %p778_p7 = pnand %p776_p5, %p736_p13  ;;  %p785_p2 = por %p784_p0, %p783_p12 }
  0x37   : > { %p779_p9 = pneg %p778_p7 }
  0x39   : > { %p786_p1 = pnand %p785_p2, %p779_p9 }
  0x3b   : > { %789 = shalt.err (!%p786_p1)
}
  0x3c   : > { %666 = dma.hbm_to_vmem [thread:$0]  (!%p972_p11), %s1164_s2, 256, %s976_s25, [#allocation6], %s894_s7, %s894_s7, %s895_s8  }
  0x3d   : > { %s1031_s4 = sadd.s32 1, %s890_s15   ;;  %s27_s23 = sadd.s32 1, %s886_s14 }
  0x3e   : > { %s24_s5 = ssub.s32 %s890_s15, %s1031_s4  ;;  %p34_p13 = scmp.ne.s32.totalorder %s886_s14, %s882_s13 }
  0x3f   : > { %p25_p6 = scmp.eq.s32.totalorder %s24_s5, 0  ;;  %p35_p10 = scmp.eq.s32.totalorder %s890_s15, 0 }
  0x40   : > { %p1173_p3 = scmp.eq.s32.totalorder %s942_s16, 1  ;;  %p677_p7 = scmp.lt.s32.totalorder %s890_s15, 2 }
  0x41   : > { %s1047_s9 = scalar_select %p25_p6, %s886_s14, %s27_s23  }
  0x42   : > { %p1041_p5 = por %p1173_p3, %p34_p13  ;;  %p36_p9 = por %p35_p10, %p34_p13 }
  0x43   : > { %s158_s10 = sand.u32 1, %s886_s14   ;;  %s636_s25 = sshll.u32 %s890_s15, 7 }
  0x44   : > { %s1174_s6 = scalar_select %p1041_p5, 1, 0 }
  0x45   : > { %s616_s11 = sshll.u32 %s158_s10, 3  ;;  %s1054_s17 = scalar_lea.hbm %s1162_s0, %s636_s25 }
  0x46   : > { %s162_s21 = scalar_lea.vmem [#allocation2], %s616_s11  ;;  %p1058_p11 = pnand %p677_p7, %p36_p9 }
  0x47   : > { %s170_s24 = sshll.u32 %s162_s21, 4  ;;  %s159_s27 = scalar_lea.sflag [#allocation3], %s158_s10  ;;  %s1056_s24 = int_to_ptr.vmem [resolvable:$true] %s170_s24 }
  0x48   : > { %s790_s28 = scalar_lea.hbm %s1054_s17, 128  ;;  %p792_p0 = pneg %p1058_p11 }
  0x49   : > { %p791_p12 = scmp.ne.s32.totalorder %s1054_s17, %s790_s28  ;;  %s795_s30 = scalar_lea.hbm %s1162_s0, 256 }
  0x4a   : > { %p796_p13 = scmp.lt.u32.totalorder %s1054_s17, %s1162_s0  ;;  %p797_p6 = scmp.lt.u32.totalorder %s795_s30, %s790_s28 }
  0x4b   : > { %p793_p2 = pnand %p792_p0, %p791_p12  ;;  %p799_p3 = scmp.lt.u32.totalorder %s790_s28, %s1054_s17 }
  0x4c   : > { %p798_p10 = por %p797_p6, %p796_p13 }
  0x4d   : > { %p794_p1 = pneg %p793_p2 }
  0x4e   : > { %p800_p7 = por %p799_p3, %p798_p10 }
  0x50   : > { %p801_p9 = pnand %p800_p7, %p794_p1 }
  0x52   : > { %804 = shalt.err (!%p801_p9)
}
  0x53   : > { %s805_s10 = scalar_lea.vmem %s1056_s24, 128  ;;  %s896_s11 = smov [#allocation2]  }
  0x54   : > { %p806_p12 = scmp.ne.s32.totalorder %s1056_s24, %s805_s10  ;;  %s810_s25 = sshll.u32 %s896_s11, 4  ;;  %s811_s25 = int_to_ptr.vmem [resolvable:$false] %s810_s25 }
  0x55   : > { %s812_s7 = scalar_lea.vmem %s811_s25, 256  ;;  %p813_p4 = scmp.lt.s32.totalorder %s1056_s24, %s811_s25 }
  0x56   : > { %p808_p2 = pnand %p806_p12, %p792_p0  ;;  %p814_p13 = scmp.lt.s32.totalorder %s812_s7, %s805_s10 }
  0x58   : > { %p809_p5 = pneg %p808_p2  ;;  %p815_p6 = por %p814_p13, %p813_p4 }
  0x5a   : > { %p816_p10 = pnand %p815_p6, %p809_p5 }
  0x5c   : > { %819 = shalt.err (!%p816_p10)
}
  0x5d   : > { %670 = dma.hbm_to_vmem [thread:$0]  (!%p1058_p11), %s1054_s17, 128, %s1056_s24, %s159_s27  }
  0x5e   : > { %179 = sbr.rel (%p961_p8) target bundleno = 607 (0x25f), region = 32  ;;  %s1090_s8 = sand.u32 (!%p961_p8), 1, %s882_s13  }
  0x5f   : > { %s620_s21 = sshll.u32 (!%p961_p8), %s1090_s8, 3  ;;  %s182_s28 = scalar_lea.sflag (!%p961_p8), [#allocation3], %s1090_s8 }
  0x60   : > { %s185_s22 = scalar_lea.vmem (!%p961_p8), [#allocation2], %s620_s21  ;;  %p1176_p4 = scmp.ne.s32.totalorder (!%p961_p8), %s1169_s18, 0 }
  0x65   : > { %865 = dma.done.wait (%p1176_p4), %s182_s28, 128  }
  0x66   : > { %867 = vsyncadd (%p1176_p4), %s182_s28, 4294967168  ;;  %p1177_p5 = scmp.eq.s32.totalorder %s942_s16, 0 }
  0x68   : > { %869 = dma.done.wait (%p1177_p5), [#allocation6], 512   ;;  %p1178_p11 = pmov %p1177_p5 }
  0x69   : > { %v897_v0 = vmov 0.0   ;;  %v218_v1 = vld [vmem:[%s185_s22] sm:$0xff]  ;;  %vm226_vm0 = vcmask 1043456   ;;  %vm238_vm1 = vcmask 1040384   ;;  %vm898_vm2 = vmmov 1   ;;  %v229_v10 = vld [vmem:[#allocation5] sm:$0xff] }
  0x6a   : > { %871 = vsyncadd (%p1178_p11), [#allocation6], 4294966784  ;;  %306 = vmatprep.mubr.f32.mxu0 %v897_v0  ;;  %420 = vmatprep.mubr.f32.mxu1 %v897_v0  ;;  %v219_v2 = vmul.f32 %v218_v1, %v218_v1  ;;  %v224_v3 = vcombine.low %v218_v1, %v218_v1  ;;  %v899_v7 = vmov 1.0   ;;  %vm231_vm4 = vcmask 72704   ;;  %v230_v11 = vld [vmem:[#allocation5 + $0x8] sm:$0xff]  ;;  %v347_v28 = vld [vmem:[#allocation7] sm:$0xff] }
  0x6b   : > { %vm639_vm3 = vmpackc.low %vm238_vm1, %vm898_vm2  ;;  %vm349_vm5 = vcmask 130048   ;;  %v348_v29 = vld [vmem:[#allocation7 + $0x8] sm:$0x3]  ;;  %v433_v35 = vcombine.high %v218_v1, %v218_v1  ;;  %v435_v37 = vsel %vm226_vm0, %v218_v1, 1.0  ;;  %vm439_vm6 = vcmask 1044480   ;;  %s623_s18 = sshll.u32 %s1090_s8, 2 }
  0x6c   : > { %v221_v4 = vcombine.high %v219_v2, %v219_v2  ;;  %v227_v5 = vsel %vm226_vm0, %v219_v2, %v224_v3  ;;  %v456_v41 = vrot.slane %v435_v37, 3  ;;  %vm468_vm7 = vcmask 1042432   ;;  %s637_s20 = sshll.u32 %s942_s16, 6  ;;  %s215_s17 = scalar_lea.vmem [#allocation8], %s623_s18 }
  0x6d   : > { %v641_v8 = vpack.c.bf16 %v899_v7, %v227_v5  ;;  %v436_v39 = vsel %vm226_vm0, %v433_v35, 1.0  ;;  %s522_s24 = sshll.u32 %s215_s17, 4  ;;  %s1118_s29 = scalar_lea.hbm %s1165_s3, %s637_s20  ;;  %s1120_s24 = int_to_ptr.vmem [resolvable:$true] %s522_s24 }
  0x6e   : > { %v228_v6 = vsel %vm226_vm0, %v221_v4, %v218_v1  ;;  %v457_v43 = vrot.slane %v436_v39, 3  ;;  %s508_s30 = scalar_lea.sflag [#allocation4], %s1090_s8  ;;  %s820_s23 = scalar_lea.vmem %s1120_s24, 64 }
  0x6f   : > { %v638_v9 = vpack.c.bf16 %v899_v7, %v228_v6  ;;  %p821_p8 = scmp.ne.s32.totalorder %s1120_s24, %s820_s23  ;;  %p1179_p0 = scmp.ne.s32.totalorder %s1174_s6, 0 }
  0x70   : > { %s900_s16 = smov [#allocation8]  }
  0x71   : > { %640 = vmatprep.subr.msk.bf16.mxu0 %vm639_vm3, %v638_v9  ;;  %p822_p1 = pnand %p821_p8, %p1179_p0  ;;  %s824_s5 = sshll.u32 %s900_s16, 4  ;;  %s825_s5 = int_to_ptr.vmem [resolvable:$false] %s824_s5 }
  0x72   : > { %643 = vmatpush1.bf16.msk.msra.mxu0 %vm639_vm3, %v641_v8  ;;  %s826_s10 = scalar_lea.vmem %s825_s5, 128  ;;  %p827_p7 = scmp.lt.s32.totalorder %s1120_s24, %s825_s5 }
  0x73   : > { %p823_p3 = pneg %p822_p1  ;;  %p828_p9 = scmp.lt.s32.totalorder %s826_s10, %s820_s23 }
  0x75   : > { %626 = vmatmul.mubr.msk.f32.vlgmr.msra.gmra.mrb[0].mxu0 %vm231_vm4, %v229_v10  ;;  %p829_p12 = por %p828_p9, %p827_p7 }
  0x76   : > { %312 = vmatprep.mubr.f32.mxu0 %v897_v0 }
  0x77   : > { %p830_p2 = pnand %p829_p12, %p823_p3 }
  0x79   : > { %627 = vmatmul.mubr.msk.f32.gmra.mrb[2].mxu0 %vm231_vm4, %v230_v11 }
 0x148   : > { %v308_v12 = vpop.f32.mrb[0].mxu0 }
 0x149   : > { %v319_v13 = vmul.f32 1.442695, %v308_v12  ;;  %v310_v14 = vpop.f32.mrb[1].mxu0 }
 0x14a   : > { %v321_v15 = vmul.f32 1.442695, %v310_v14 }
 0x14b   : > { %722 = vpow2.f32 %v319_v13 }
 0x14c   : > { %v314_v16 = vpop.f32.mrb[2].mxu0  ;;  %724 = vpow2.f32 %v321_v15 }
 0x14d   : > { %v323_v17 = vmul.f32 1.442695, %v314_v16  ;;  %v316_v18 = vpop.f32.mrb[3].mxu0 }
 0x14e   : > { %v325_v19 = vmul.f32 1.442695, %v316_v18 }
 0x14f   : > { %726 = vpow2.f32 %v323_v17 }
 0x150   : > { %728 = vpow2.f32 %v325_v19 }
 0x155   : > { %v723_v20 = vpop.eup %722 }
 0x156   : > { %v725_v21 = vpop.eup %724 }
 0x159   : > { %v727_v22 = vpop.eup %726 }
 0x15a   : > { %v729_v23 = vpop.eup %728  ;;  %v327_v24 = vadd.f32 %v727_v22, %v723_v20  ;;  %v646_v25 = vpack.c.bf16 %v727_v22, %v723_v20 }
 0x15b   : > { %v334_v26 = vadd.f32 %v729_v23, %v725_v21  ;;  %v644_v27 = vpack.c.bf16 %v729_v23, %v725_v21 }
 0x15c   : > { %v328_v30 = vrot.slane %v327_v24, 4 }
 0x15d   : > { %645 = vmatprep.subr.bf16.mxu1 %v644_v27  ;;  %v335_v31 = vrot.slane %v334_v26, 4 }
 0x15e   : > { %647 = vmatpush1.bf16.msra.mxu1 %v646_v25  ;;  %v329_v32 = vadd.f32 %v328_v30, %v327_v24 }
 0x15f   : > { %v336_v33 = vadd.f32 %v335_v31, %v334_v26 }
 0x160   : > { %v330_v34 = vrot.slane %v329_v32, 2 }
 0x161   : > { %628 = vmatmul.mubr.msk.f32.vlgmr.msra.gmra.mrb[0].mxu1 %vm349_vm5, %v347_v28  ;;  %v337_v36 = vrot.slane %v336_v33, 2 }
 0x162   : > { %426 = vmatprep.mubr.f32.mxu1 %v897_v0  ;;  %v331_v38 = vadd.f32 %v330_v34, %v329_v32 }
 0x163   : > { %v338_v40 = vadd.f32 %v337_v36, %v336_v33 }
 0x164   : > { %v332_v44 = vrot.slane %v331_v38, 1 }
 0x165   : > { %629 = vmatmul.mubr.msk.f32.gmra.mrb[2].mxu1 %vm349_vm5, %v348_v29  ;;  %v339_v47 = vrot.slane %v338_v40, 1 }
 0x166   : > { %v333_v55 = vadd.f32 %v332_v44, %v331_v38 }
 0x167   : > { %v340_v59 = vadd.f32 %v339_v47, %v338_v40 }
 0x168   : > { %v341_v3 = vmax.f32 %v333_v55, 1e-12 }
 0x169   : > { %v342_v6 = vmax.f32 %v340_v59, 1e-12 }
 0x16a   : > { %730 = vrcp.f32 %v341_v3 }
 0x16b   : > { %732 = vrcp.f32 %v342_v6 }
 0x174   : > { %v731_v29 = vpop.eup %730 }
 0x175   : > { %v733_v31 = vpop.eup %732 }
 0x234   : > { %v422_v42 = vpop.f32.mrb[0].mxu1 }
 0x235   : > { %v437_v45 = vmul.f32 %v435_v37, %v422_v42  ;;  %v424_v46 = vpop.f32.mrb[1].mxu1  ;;  %v460_v50 = vmul.f32 %v456_v41, %v422_v42 }
 0x236   : > { %v438_v48 = vmul.f32 %v436_v39, %v424_v46  ;;  %v461_v53 = vmul.f32 %v457_v43, %v424_v46 }
 0x237   : > { %v440_v49 = vsel %vm439_vm6, %v437_v45, 0.0  ;;  %v469_v62 = vrot.slane %v460_v50, 5 }
 0x238   : > { %v441_v51 = vrot.slane %v440_v49, 4  ;;  %v447_v52 = vsel %vm439_vm6, %v438_v48, 0.0  ;;  %v428_v54 = vpop.f32.mrb[2].mxu1  ;;  %v472_v1 = vrot.slane %v461_v53, 5 }
 0x239   : > { %v448_v56 = vrot.slane %v447_v52, 4  ;;  %v462_v57 = vmul.f32 %v456_v41, %v428_v54  ;;  %v430_v58 = vpop.f32.mrb[3].mxu1 }
 0x23a   : > { %v442_v60 = vadd.f32 %v441_v51, %v440_v49  ;;  %v463_v61 = vmul.f32 %v457_v43, %v430_v58 }
 0x23b   : > { %v449_v63 = vadd.f32 %v448_v56, %v447_v52  ;;  %v470_v0 = vrot.slane %v462_v57, 5 }
 0x23c   : > { %v473_v2 = vrot.slane %v463_v61, 5  ;;  %v443_v4 = vrot.slane %v442_v60, 2 }
 0x23d   : > { %v471_v5 = vsel %vm468_vm7, %v469_v62, %v470_v0  ;;  %v450_v7 = vrot.slane %v449_v63, 2 }
 0x23e   : > { %v477_v8 = vsel %vm439_vm6, %v471_v5, 0.0  ;;  %v474_v9 = vsel %vm468_vm7, %v472_v1, %v473_v2  ;;  %v444_v13 = vadd.f32 %v443_v4, %v442_v60 }
 0x23f   : > { %v478_v10 = vrot.slane %v477_v8, 4  ;;  %v484_v11 = vsel %vm439_vm6, %v474_v9, 0.0  ;;  %v451_v15 = vadd.f32 %v450_v7, %v449_v63 }
 0x240   : > { %v485_v12 = vrot.slane %v484_v11, 4  ;;  %v445_v19 = vrot.slane %v444_v13, 1 }
 0x241   : > { %v479_v14 = vadd.f32 %v478_v10, %v477_v8  ;;  %v452_v21 = vrot.slane %v451_v15, 1 }
 0x242   : > { %v486_v16 = vadd.f32 %v485_v12, %v484_v11  ;;  %v446_v25 = vadd.f32 %v445_v19, %v444_v13 }
 0x243   : > { %v480_v17 = vrot.slane %v479_v14, 2  ;;  %v453_v27 = vadd.f32 %v452_v21, %v451_v15 }
 0x244   : > { %v487_v18 = vrot.slane %v486_v16, 2 }
 0x245   : > { %v481_v20 = vadd.f32 %v480_v17, %v479_v14 }
 0x246   : > { %v488_v22 = vadd.f32 %v487_v18, %v486_v16 }
 0x247   : > { %v482_v23 = vrot.slane %v481_v20, 1 }
 0x248   : > { %v489_v24 = vrot.slane %v488_v22, 1 }
 0x249   : > { %v483_v26 = vadd.f32 %v482_v23, %v481_v20 }
 0x24a   : > { %v490_v28 = vadd.f32 %v489_v24, %v488_v22 }
 0x24b   : > { %v491_v30 = vsel %vm238_vm1, %v446_v25, %v483_v26 }
 0x24c   : > { %v492_v32 = vsel %vm238_vm1, %v453_v27, %v490_v28  ;;  %v493_v33 = vmul.f32 %v731_v29, %v491_v30 }
 0x24d   : > { %v494_v34 = vmul.f32 %v733_v31, %v492_v32 }
 0x24f   : > { %v497_v35 = vcombine.low %v493_v33, %v494_v34 }
 0x251   : > { %630 = vst.sshfl [vmem:[%s215_s17] sm:$0x33 pattern:$0x76325410] %v497_v35 }
 0x252   : > { %833 = shalt.err (!%p830_p2)
}
 0x253   : > { %s834_s11 = scalar_lea.hbm %s1118_s29, 64  ;;  %s838_s8 = scalar_lea.hbm %s1165_s3, 128 }
 0x254   : > { %p835_p13 = scmp.ne.s32.totalorder %s1118_s29, %s834_s11  ;;  %p839_p4 = scmp.lt.u32.totalorder %s1118_s29, %s1165_s3 }
 0x255   : > { %p840_p5 = scmp.lt.u32.totalorder %s838_s8, %s834_s11  ;;  %p842_p8 = scmp.lt.u32.totalorder %s834_s11, %s1118_s29 }
 0x256   : > { %p836_p6 = pnand %p835_p13, %p1179_p0 }
 0x257   : > { %p841_p11 = por %p840_p5, %p839_p4 }
 0x258   : > { %p837_p10 = pneg %p836_p6 }
 0x259   : > { %p843_p1 = por %p842_p8, %p841_p11 }
 0x25b   : > { %p844_p3 = pnand %p843_p1, %p837_p10 }
 0x25d   : > { %847 = shalt.err (!%p844_p3)
}
 0x25e   : > { %658 = dma.vmem_to_hbm [thread:$0]  (%p1179_p0), %s1120_s24, 64, %s1118_s29, %s508_s30  }
 0x25f PF: > { %s534_s22 = sand.u32 1, %s878_s12   ;;  %p1180_p7 = scmp.ne.s32.totalorder %s1170_s19, 0 }
 0x260   : > { %p1181_p9 = scmp.ge.s32.totalorder %s890_s15, 2  ;;  %s535_s18 = scalar_lea.sflag [#allocation4], %s534_s22 }
 0x262   : > { %p672_p12 = pnand %p1181_p9, %p1180_p7 }
 0x264   : > { %873 = dma.done.wait (!%p672_p12), %s535_s18, 64  }
 0x265   : > { %875 = vsyncadd (!%p672_p12), %s535_s18, 4294967232  ;;  %p17_p2 = scmp.ge.s32.totalorder %s1031_s4, 4   ;;  %s1182_s12 = smov %s882_s13 }
 0x266   : > { %s1183_s13 = smov %s886_s14  ;;  %s1184_s14 = smov %s1047_s9 }
 0x267   : > { %s1185_s15 = smov %s1031_s4  ;;  %19 = sbr.rel (!%p17_p2) target bundleno = 6 (0x6), region = 85 }
 0x26e   :  { %540 = vsyncpa [#allocation3], 1 }
 0x26f   :  { %542 = vsyncpa [#allocation3 + $0x1], 1 }
 0x270   :  { %543 = vsyncpa [#allocation6], 1 }
 0x271   :  { %544 = vsyncpa [#allocation4], 1 }
 0x272   :  { %546 = vsyncpa [#allocation4 + $0x1], 1 }

</bundles_post_ra>
